<compile_context>
chip_gen: v7x
topology: tpu7x:2x2x1
jax: 0.10.0
libtpu: 0.0.40
codegen_flags: <defaults>
</compile_context>

<pallas_src>
import math

import jax
import jax.numpy as jnp
import numpy as np
from jax.experimental import pallas as pl
from jax.experimental.pallas import tpu as pltpu

IN_DIM = 256       # SimpleAE in_dim
HIDDEN_DIM = 128   # SimpleAE hidden_dim


# ---------------------------------------------------------------------------
# Fused kernel: sigmoid(relu(x @ We + be) @ Wd + bd) for one batch tile.
# ---------------------------------------------------------------------------
def simple_ae_kernel(x_ref, we_ref, be_ref, wd_ref, bd_ref, o_ref):
    x = x_ref[...]                                                  # (bt, in)
    e = jnp.dot(x, we_ref[...], preferred_element_type=jnp.float32) + be_ref[...]
    e = jnp.maximum(e, 0.0)                                         # ReLU
    d = jnp.dot(e, wd_ref[...], preferred_element_type=jnp.float32) + bd_ref[...]
    o_ref[...] = jax.nn.sigmoid(d)                                  # EUP exp path


# ---------------------------------------------------------------------------
# Wrapper
# ---------------------------------------------------------------------------
def simple_ae_pallas(x, p):
    bz, in_dim = x.shape

    # Batch tile: whole batch when small; otherwise 256-row tiles to fill the
    # MXU M dimension on v6e/v7x (tile must divide the batch and be a multiple
    # of 8 to satisfy the (8, 128) layout constraint).
    if bz <= 256 or bz % 256 != 0:
        bt = bz
    else:
        bt = 256
    grid = (bz // bt,)

    def full_spec(a):
        return pl.BlockSpec(a.shape, lambda i, _nd=a.ndim: (0,) * _nd)

    return pl.pallas_call(
        simple_ae_kernel,
        out_shape=jax.ShapeDtypeStruct((bz, in_dim), jnp.float32),
        grid=grid,
        in_specs=[
            pl.BlockSpec((bt, in_dim), lambda i: (i, 0)),   # x: tiled over batch
            full_spec(p["w_enc"]),                          # weights resident in VMEM
            full_spec(p["b_enc"]),
            full_spec(p["w_dec"]),
            full_spec(p["b_dec"]),
        ],
        out_specs=pl.BlockSpec((bt, in_dim), lambda i: (i, 0)),
        compiler_params=pltpu.CompilerParams(
            dimension_semantics=("parallel",)),
    )(x, p["w_enc"], p["b_enc"], p["w_dec"], p["b_dec"])


# ---------------------------------------------------------------------------
# Deterministic parameter init (nn.Linear-style; stored pre-transposed (in, out))
# ---------------------------------------------------------------------------
def init_params(key):
    k_we, k_be, k_wd, k_bd = jax.random.split(key, 4)

    def lin(kw, kb, din, dout):
        bound = 1.0 / math.sqrt(din)
        w = jax.random.uniform(kw, (din, dout), jnp.float32, -bound, bound)
        b = jax.random.uniform(kb, (1, dout), jnp.float32, -bound, bound)
        return w, b

    p = {}
    p["w_enc"], p["b_enc"] = lin(k_we, k_be, IN_DIM, HIDDEN_DIM)
    p["w_dec"], p["b_dec"] = lin(k_wd, k_bd, HIDDEN_DIM, IN_DIM)
    return p


# ---------------------------------------------------------------------------
# Pure-JAX reference (mirrors the PyTorch forward exactly)
# ---------------------------------------------------------------------------
def ref_forward(x, p):
    e = jax.nn.relu(x @ p["w_enc"] + p["b_enc"])
    return jax.nn.sigmoid(e @ p["w_dec"] + p["b_dec"])


if __name__ == "__main__":
    key = jax.random.PRNGKey(0)
    pkey, xkey = jax.random.split(key)
    params = init_params(pkey)
    x = jax.random.normal(xkey, (2, IN_DIM), jnp.float32)   # batch=2

    out = jax.jit(simple_ae_pallas)(x, params)
    out = jax.block_until_ready(out)

    ref = ref_forward(x, params)
    assert out.shape == (2, IN_DIM)
    np.testing.assert_allclose(np.asarray(out), np.asarray(ref),
                               atol=1e-5, rtol=1e-5)
    print("KERNEL_OK")
</pallas_src>

<mosaic_0001>
module attributes {stable_mosaic.version = 11 : i64} {
  func.func @simple_ae_kernel(%arg0: i32, %arg1: memref<2x256xf32, #tpu.memory_space<vmem>>, %arg2: memref<256x128xf32, #tpu.memory_space<vmem>>, %arg3: memref<1x128xf32, #tpu.memory_space<vmem>>, %arg4: memref<128x256xf32, #tpu.memory_space<vmem>>, %arg5: memref<1x256xf32, #tpu.memory_space<vmem>>, %arg6: memref<2x256xf32, #tpu.memory_space<vmem>>) attributes {dimension_semantics = [#tpu.dimension_semantics<parallel>], iteration_bounds = array<i64: 1>, scalar_prefetch = 0 : i64, scratch_operands = 0 : i64, tpu.core_type = #tpu.core_type<tc>, window_params = [{transform_indices = @transform_0, window_bounds = array<i64: 2, 256>}, {pipeline_mode = #tpu.pipeline_mode<synchronous>, transform_indices = @transform_1, window_bounds = array<i64: 256, 128>}, {pipeline_mode = #tpu.pipeline_mode<synchronous>, transform_indices = @transform_2, window_bounds = array<i64: 1, 128>}, {pipeline_mode = #tpu.pipeline_mode<synchronous>, transform_indices = @transform_3, window_bounds = array<i64: 128, 256>}, {pipeline_mode = #tpu.pipeline_mode<synchronous>, transform_indices = @transform_4, window_bounds = array<i64: 1, 256>}, {transform_indices = @transform_5, window_bounds = array<i64: 2, 256>}]} {
    %c0 = arith.constant 0 : index
    %c0_0 = arith.constant 0 : index
    %0 = vector.load %arg1[%c0, %c0_0] : memref<2x256xf32, #tpu.memory_space<vmem>>, vector<2x256xf32>
    %c0_1 = arith.constant 0 : index
    %c0_2 = arith.constant 0 : index
    %1 = vector.load %arg2[%c0_1, %c0_2] : memref<256x128xf32, #tpu.memory_space<vmem>>, vector<256x128xf32>
    %cst = arith.constant dense<0.000000e+00> : vector<2x128xf32>
    %2 = tpu.matmul %0, %1, %cst {dimension_numbers = #tpu.dot_dimension_numbers<[1], [0], [0], [1], [0, 0, 1, 1], [], []>} : vector<2x256xf32>, vector<256x128xf32>, vector<2x128xf32> -> vector<2x128xf32>
    %c0_3 = arith.constant 0 : index
    %c0_4 = arith.constant 0 : index
    %3 = vector.load %arg3[%c0_3, %c0_4] : memref<1x128xf32, #tpu.memory_space<vmem>>, vector<1x128xf32>
    %4 = vector.broadcast %3 : vector<1x128xf32> to vector<2x128xf32>
    %5 = arith.addf %2, %4 : vector<2x128xf32>
    %cst_5 = arith.constant 0.000000e+00 : f32
    %6 = vector.broadcast %cst_5 : f32 to vector<2x128xf32>
    %7 = arith.maximumf %5, %6 : vector<2x128xf32>
    %c0_6 = arith.constant 0 : index
    %c0_7 = arith.constant 0 : index
    %8 = vector.load %arg4[%c0_6, %c0_7] : memref<128x256xf32, #tpu.memory_space<vmem>>, vector<128x256xf32>
    %cst_8 = arith.constant dense<0.000000e+00> : vector<2x256xf32>
    %9 = tpu.matmul %7, %8, %cst_8 {dimension_numbers = #tpu.dot_dimension_numbers<[1], [0], [0], [1], [0, 0, 1, 1], [], []>} : vector<2x128xf32>, vector<128x256xf32>, vector<2x256xf32> -> vector<2x256xf32>
    %c0_9 = arith.constant 0 : index
    %c0_10 = arith.constant 0 : index
    %10 = vector.load %arg5[%c0_9, %c0_10] : memref<1x256xf32, #tpu.memory_space<vmem>>, vector<1x256xf32>
    %11 = vector.broadcast %10 : vector<1x256xf32> to vector<2x256xf32>
    %12 = arith.addf %9, %11 : vector<2x256xf32>
    %13 = arith.negf %12 : vector<2x256xf32>
    %14 = math.exp %13 : vector<2x256xf32>
    %cst_11 = arith.constant 1.000000e+00 : f32
    %15 = vector.broadcast %cst_11 : f32 to vector<2x256xf32>
    %16 = arith.addf %15, %14 : vector<2x256xf32>
    %17 = arith.divf %15, %16 : vector<2x256xf32>
    %c0_12 = arith.constant 0 : index
    %c0_13 = arith.constant 0 : index
    %18 = vector.load %arg6[%c0_12, %c0_13] : memref<2x256xf32, #tpu.memory_space<vmem>>, vector<2x256xf32>
    tpu.vector_store %arg6[%c0_12, %c0_13], %17 {strides = array<i32>} : memref<2x256xf32, #tpu.memory_space<vmem>>, vector<2x256xf32>,
    return
  }
  func.func @transform_0(%arg0: i32) -> (i32, i32) {
    %c0_i32 = arith.constant 0 : i32
    %c0_i32_0 = arith.constant 0 : i32
    return %arg0, %c0_i32 : i32, i32
  }
  func.func @transform_1(%arg0: i32) -> (i32, i32) {
    %c0_i32 = arith.constant 0 : i32
    %c0_i32_0 = arith.constant 0 : i32
    %c0_i32_1 = arith.constant 0 : i32
    return %c0_i32, %c0_i32_0 : i32, i32
  }
  func.func @transform_2(%arg0: i32) -> (i32, i32) {
    %c0_i32 = arith.constant 0 : i32
    %c0_i32_0 = arith.constant 0 : i32
    %c0_i32_1 = arith.constant 0 : i32
    return %c0_i32, %c0_i32_0 : i32, i32
  }
  func.func @transform_3(%arg0: i32) -> (i32, i32) {
    %c0_i32 = arith.constant 0 : i32
    %c0_i32_0 = arith.constant 0 : i32
    %c0_i32_1 = arith.constant 0 : i32
    return %c0_i32, %c0_i32_0 : i32, i32
  }
  func.func @transform_4(%arg0: i32) -> (i32, i32) {
    %c0_i32 = arith.constant 0 : i32
    %c0_i32_0 = arith.constant 0 : i32
    %c0_i32_1 = arith.constant 0 : i32
    return %c0_i32, %c0_i32_0 : i32, i32
  }
  func.func @transform_5(%arg0: i32) -> (i32, i32) {
    %c0_i32 = arith.constant 0 : i32
    %c0_i32_0 = arith.constant 0 : i32
    return %arg0, %c0_i32 : i32, i32
  }
}

</mosaic_0001>

<bundles_post_ra>
// kernel: simple_ae_pallas.1
= control target key start
LH: loop header
LB: loop body
LE: loop exit
PB: predicated region body
PF: predicated region fallthrough
CT: control target
= control target key end

     0   :  { %10 = vsyncpa [#allocation3], 0  ;;  %s650_s0 = inlined_call_operand.hbm [shape: f32[2,256], index: 0, kind: input, shape index: {}]   ;;  %s651_s1 = inlined_call_operand.hbm [shape: f32[256,128], index: 1, kind: input, shape index: {}]   ;;  %s652_s2 = inlined_call_operand.vmem [shape: f32[1,128], index: 2, kind: input, shape index: {}]   ;;  %s653_s3 = inlined_call_operand.hbm [shape: f32[128,256], index: 3, kind: input, shape index: {}]   ;;  %s654_s4 = inlined_call_operand.vmem [shape: f32[1,256], index: 4, kind: input, shape index: {}]   ;;  %s655_s5 = inlined_call_operand.hbm [shape: f32[2,256], index: 5, kind: output, shape index: {}]  }
   0x1   :  { %11 = vsyncpa [#allocation6], 0 }
   0x2   :  { %12 = vsyncpa [#allocation4], 0  ;;  %s552_s18 = smov [#allocation5]   ;;  %s458_s22 = scalar_lea.hbm %s651_s1, 4096 }
   0x3   :  { %s28_s19 = sshll.u32 %s552_s18, 4  ;;  %p459_p0 = scmp.ne.s32.totalorder %s651_s1, %s458_s22  ;;  %s29_s19 = int_to_ptr.vmem [resolvable:$true] %s28_s19 }
   0x4   :  { %p462_p1 = scmp.lt.u32.totalorder %s458_s22, %s651_s1 }
   0x6   :  { %p464_p2 = pnand %p462_p1, %p459_p0 }
   0x8   :  { %467 = shalt.err (!%p464_p2)
}
   0x9   :  { %s468_s27 = scalar_lea.vmem %s29_s19, 4096  ;;  %p473_p4 = scmp.lt.s32.totalorder %s29_s19, %s29_s19 }
   0xa   :  { %p469_p3 = scmp.ne.s32.totalorder %s29_s19, %s468_s27  ;;  %p474_p5 = scmp.lt.s32.totalorder %s468_s27, %s468_s27 }
   0xc   :  { %p475_p6 = por %p474_p5, %p473_p4 }
   0xe   :  { %p476_p7 = pnand %p475_p6, %p469_p3 }
  0x10   :  { %479 = shalt.err (!%p476_p7)
}
  0x11   :  { %s553_s28 = smov 128   ;;  %s554_s29 = smov 8  }
  0x12   :  { %34 = dma.hbm_to_vmem [thread:$0]  %s651_s1, 4096, %s29_s19, [#allocation6], %s553_s28, %s553_s28, %s554_s29  }
  0x13   :  { %s555_s7 = smov [#allocation2]   ;;  %s556_s9 = smov [#allocation7]  }
  0x14   :  { %s19_s8 = sshll.u32 %s555_s7, 4  ;;  %s42_s10 = sshll.u32 %s556_s9, 4  ;;  %s20_s8 = int_to_ptr.vmem [resolvable:$true] %s19_s8  ;;  %s43_s10 = int_to_ptr.vmem [resolvable:$true] %s42_s10 }
  0x15   :  { %s480_s13 = scalar_lea.hbm %s650_s0, 64 }
  0x16   :  { %p481_p8 = scmp.ne.s32.totalorder %s650_s0, %s480_s13  ;;  %p484_p9 = scmp.lt.u32.totalorder %s480_s13, %s650_s0 }
  0x18   :  { %p486_p10 = pnand %p484_p9, %p481_p8 }
  0x1a   :  { %489 = shalt.err (!%p486_p10)
}
  0x1b   :  { %s490_s1 = scalar_lea.vmem %s20_s8, 64  ;;  %p495_p12 = scmp.lt.s32.totalorder %s20_s8, %s20_s8 }
  0x1c   :  { %p491_p11 = scmp.ne.s32.totalorder %s20_s8, %s490_s1  ;;  %p496_p13 = scmp.lt.s32.totalorder %s490_s1, %s490_s1 }
  0x1e   :  { %p497_p0 = por %p496_p13, %p495_p12 }
  0x20   :  { %p498_p1 = pnand %p497_p0, %p491_p11 }
  0x22   :  { %501 = shalt.err (!%p498_p1)
}
  0x23   :  { %22 = dma.hbm_to_vmem [thread:$0]  %s650_s0, 64, %s20_s8, [#allocation3]  }
  0x24   :  { %s502_s22 = scalar_lea.hbm %s653_s3, 4096 }
  0x25   :  { %p503_p2 = scmp.ne.s32.totalorder %s653_s3, %s502_s22  ;;  %p506_p3 = scmp.lt.u32.totalorder %s502_s22, %s653_s3 }
  0x27   :  { %p508_p4 = pnand %p506_p3, %p503_p2 }
  0x29   :  { %511 = shalt.err (!%p508_p4)
}
  0x2a   :  { %s512_s27 = scalar_lea.vmem %s43_s10, 4096  ;;  %p517_p6 = scmp.lt.s32.totalorder %s43_s10, %s43_s10 }
  0x2b   :  { %p513_p5 = scmp.ne.s32.totalorder %s43_s10, %s512_s27  ;;  %p518_p7 = scmp.lt.s32.totalorder %s512_s27, %s512_s27 }
  0x2d   :  { %p519_p8 = por %p518_p7, %p517_p6 }
  0x2f   :  { %p520_p9 = pnand %p519_p8, %p513_p5 }
  0x31   :  { %523 = shalt.err (!%p520_p9)
}
  0x32   :  { %s557_s0 = smov 256   ;;  %s558_s28 = smov 16  }
  0x33   :  { %48 = dma.hbm_to_vmem [thread:$0]  %s653_s3, 4096, %s43_s10, [#allocation6], %s557_s0, %s557_s0, %s558_s28  }
  0x34   :  { %546 = dma.done.wait [#allocation3], 64  }
  0x35   :  { %547 = vsyncadd [#allocation3], 4294967232 }
  0x36   :  { %548 = dma.done.wait [#allocation6], 8192  }
  0x37   :  { %549 = vsyncadd [#allocation6], 4294959104  ;;  %v77_v0 = vld [vmem:[#allocation5 + $0x80] sm:$0xff]  ;;  %v78_v1 = vld [vmem:[#allocation5 + $0x88] sm:$0xff] }
  0x38   :  { %v61_v2 = vld [vmem:[#allocation5] sm:$0xff]  ;;  %v377_v3 = vpack.c.bf16 %v78_v1, %v77_v0  ;;  %v62_v4 = vld [vmem:[#allocation5 + $0x8] sm:$0xff]  ;;  %v79_v5 = vld [vmem:[#allocation5 + $0x90] sm:$0xff] }
  0x39   :  { %v80_v6 = vld [vmem:[#allocation5 + $0x98] sm:$0xff]  ;;  %v379_v7 = vpack.c.bf16 %v62_v4, %v61_v2  ;;  %v63_v9 = vld [vmem:[#allocation5 + $0x10] sm:$0xff]  ;;  %v81_v11 = vld [vmem:[#allocation5 + $0xa0] sm:$0xff] }
  0x3a   :  { %v381_v8 = vpack.c.bf16 %v80_v6, %v79_v5  ;;  %v64_v10 = vld [vmem:[#allocation5 + $0x18] sm:$0xff]  ;;  %378 = vmatprep.subr.bf16.mxu0 %v377_v3  ;;  %v82_v12 = vld [vmem:[#allocation5 + $0xa8] sm:$0xff]  ;;  %v65_v15 = vld [vmem:[#allocation5 + $0x20] sm:$0xff] }
  0x3b   :  { %380 = vmatpush3.bf16.msra.mxu0 %v379_v7  ;;  %v383_v13 = vpack.c.bf16 %v64_v10, %v63_v9  ;;  %v385_v14 = vpack.c.bf16 %v82_v12, %v81_v11  ;;  %v66_v16 = vld [vmem:[#allocation5 + $0x28] sm:$0xff]  ;;  %v83_v17 = vld [vmem:[#allocation5 + $0xb0] sm:$0xff]  ;;  %v84_v18 = vld [vmem:[#allocation5 + $0xb8] sm:$0xff] }
  0x3c   :  { %382 = vmatprep.subr.bf16.mxu0 %v381_v8  ;;  %v387_v19 = vpack.c.bf16 %v66_v16, %v65_v15  ;;  %v389_v20 = vpack.c.bf16 %v84_v18, %v83_v17  ;;  %v67_v21 = vld [vmem:[#allocation5 + $0x30] sm:$0xff]  ;;  %v68_v22 = vld [vmem:[#allocation5 + $0x38] sm:$0xff]  ;;  %v85_v23 = vld [vmem:[#allocation5 + $0xc0] sm:$0xff] }
  0x3d   :  { %v86_v24 = vld [vmem:[#allocation5 + $0xc8] sm:$0xff]  ;;  %v627_v25 = vld.sshfl [vmem:[#allocation2] sm:$0x33 pattern:$0x76325410]  ;;  %v69_v26 = vld [vmem:[#allocation5 + $0x40] sm:$0xff]  ;;  %v391_v32 = vpack.c.bf16 %v68_v22, %v67_v21 }
  0x3e   :  { %v70_v27 = vld [vmem:[#allocation5 + $0x48] sm:$0xff]  ;;  %v108_v28 = vcombine.high %v627_v25, %v627_v25  ;;  %v185_v30 = vld [vmem:[#allocation7 + $0x18] sm:$0xff]  ;;  %v182_v31 = vld [vmem:[#allocation7] sm:$0xff]  ;;  %v393_v37 = vpack.c.bf16 %v86_v24, %v85_v23 }
  0x3f   :  { %384 = vmatpush3.bf16.msra.mxu0 %v383_v13  ;;  %v183_v29 = vld [vmem:[#allocation7 + $0x8] sm:$0xff]  ;;  %v184_v34 = vld [vmem:[#allocation7 + $0x10] sm:$0xff]  ;;  %v189_v36 = vld [vmem:[#allocation7 + $0x38] sm:$0xff]  ;;  %v395_v47 = vpack.c.bf16 %v70_v27, %v69_v26 }
  0x40   :  { %386 = vmatprep.subr.bf16.mxu0 %v385_v14  ;;  %v409_v33 = vpack.c.bf16 %v185_v30, %v183_v29  ;;  %v187_v35 = vld [vmem:[#allocation7 + $0x28] sm:$0xff]  ;;  %175 = vmatprep.mubr.f32.mxu0 %v108_v28  ;;  %v411_v38 = vpack.c.bf16 %v184_v34, %v182_v31  ;;  %v186_v40 = vld [vmem:[#allocation7 + $0x20] sm:$0xff]  ;;  %v188_v41 = vld [vmem:[#allocation7 + $0x30] sm:$0xff] }
  0x41   :  { %v413_v39 = vpack.c.bf16 %v189_v36, %v187_v35  ;;  %v191_v42 = vld [vmem:[#allocation7 + $0x48] sm:$0xff]  ;;  %v87_v43 = vld [vmem:[#allocation5 + $0xd0] sm:$0xff]  ;;  %v88_v44 = vld [vmem:[#allocation5 + $0xd8] sm:$0xff]  ;;  %v415_v46 = vpack.c.bf16 %v188_v41, %v186_v40  ;;  %v559_v35 = vmov 0.0   ;;  %v216_v41 = vlaneseq }
  0x42   :  { %410 = vmatprep.subr.bf16.mxu1 %v409_v33  ;;  %v193_v45 = vld [vmem:[#allocation7 + $0x58] sm:$0xff]  ;;  %v71_v48 = vld [vmem:[#allocation5 + $0x50] sm:$0xff]  ;;  %v190_v50 = vld [vmem:[#allocation7 + $0x40] sm:$0xff]  ;;  %v397_v52 = vpack.c.bf16 %v88_v44, %v87_v43  ;;  %290 = vmatprep.mubr.f32.mxu1 %v559_v35 }
  0x43   :  { %388 = vmatpush3.bf16.msra.mxu0 %v387_v19  ;;  %412 = vmatpush1.bf16.msra.mxu1 %v411_v38  ;;  %v417_v49 = vpack.c.bf16 %v193_v45, %v191_v42  ;;  %v192_v51 = vld [vmem:[#allocation7 + $0x50] sm:$0xff]  ;;  %v72_v53 = vld [vmem:[#allocation5 + $0x58] sm:$0xff]  ;;  %v195_v54 = vld [vmem:[#allocation7 + $0x68] sm:$0xff]  ;;  %v217_v42 = vshrl.u32 %v216_v41, 7 }
  0x44   :  { %390 = vmatprep.subr.bf16.mxu0 %v389_v20  ;;  %414 = vmatprep.subr.bf16.mxu1 %v413_v39  ;;  %v197_v55 = vld [vmem:[#allocation7 + $0x78] sm:$0xff]  ;;  %v89_v56 = vld [vmem:[#allocation5 + $0xe0] sm:$0xff]  ;;  %v90_v57 = vld [vmem:[#allocation5 + $0xe8] sm:$0xff]  ;;  %v419_v58 = vpack.c.bf16 %v192_v51, %v190_v50  ;;  %v399_v59 = vpack.c.bf16 %v72_v53, %v71_v48 }
  0x45   :  { %v73_v60 = vld [vmem:[#allocation5 + $0x60] sm:$0xff]  ;;  %v421_v61 = vpack.c.bf16 %v197_v55, %v195_v54  ;;  %v196_v63 = vld [vmem:[#allocation7 + $0x70] sm:$0xff]  ;;  %v401_v0 = vpack.c.bf16 %v90_v57, %v89_v56  ;;  %v74_v1 = vld [vmem:[#allocation5 + $0x68] sm:$0xff]  ;;  %v218_v43 = vsub.s32 0, %v217_v42  ;;  %v222_v45 = vsub.s32 1, %v217_v42 }
  0x46   :  { %v194_v62 = vld [vmem:[#allocation7 + $0x60] sm:$0xff]  ;;  %v199_v2 = vld [vmem:[#allocation7 + $0x88] sm:$0xff]  ;;  %v201_v3 = vld [vmem:[#allocation7 + $0x98] sm:$0xff]  ;;  %v403_v7 = vpack.c.bf16 %v74_v1, %v73_v60 }
  0x47   :  { %392 = vmatpush3.bf16.msra.mxu0 %v391_v32  ;;  %416 = vmatpush1.bf16.msra.mxu1 %v415_v46  ;;  %v91_v4 = vld [vmem:[#allocation5 + $0xf0] sm:$0xff]  ;;  %v92_v5 = vld [vmem:[#allocation5 + $0xf8] sm:$0xff]  ;;  %v423_v6 = vpack.c.bf16 %v196_v63, %v194_v62  ;;  %v425_v9 = vpack.c.bf16 %v201_v3, %v199_v2  ;;  %v198_v10 = vld [vmem:[#allocation7 + $0x80] sm:$0xff] }
  0x48   :  { %394 = vmatprep.subr.bf16.mxu0 %v393_v37  ;;  %418 = vmatprep.subr.bf16.mxu1 %v417_v49  ;;  %v75_v8 = vld [vmem:[#allocation5 + $0x70] sm:$0xff]  ;;  %v405_v12 = vpack.c.bf16 %v92_v5, %v91_v4  ;;  %v76_v13 = vld [vmem:[#allocation5 + $0x78] sm:$0xff]  ;;  %v203_v14 = vld [vmem:[#allocation7 + $0xa8] sm:$0xff] }
  0x49   :  { %v200_v11 = vld [vmem:[#allocation7 + $0x90] sm:$0xff]  ;;  %v205_v15 = vld [vmem:[#allocation7 + $0xb8] sm:$0xff]  ;;  %v407_v17 = vpack.c.bf16 %v76_v13, %v75_v8  ;;  %v202_v19 = vld [vmem:[#allocation7 + $0xa0] sm:$0xff] }
  0x4a   :  { %v427_v16 = vpack.c.bf16 %v200_v11, %v198_v10  ;;  %v429_v18 = vpack.c.bf16 %v205_v15, %v203_v14  ;;  %v204_v20 = vld [vmem:[#allocation7 + $0xb0] sm:$0xff]  ;;  %v207_v22 = vld [vmem:[#allocation7 + $0xc8] sm:$0xff]  ;;  %v209_v23 = vld [vmem:[#allocation7 + $0xd8] sm:$0xff] }
  0x4b   :  { %396 = vmatpush3.bf16.msra.mxu0 %v395_v47  ;;  %420 = vmatpush1.bf16.msra.mxu1 %v419_v58  ;;  %v431_v21 = vpack.c.bf16 %v204_v20, %v202_v19  ;;  %v433_v24 = vpack.c.bf16 %v209_v23, %v207_v22  ;;  %v206_v26 = vld [vmem:[#allocation7 + $0xc0] sm:$0xff]  ;;  %v208_v27 = vld [vmem:[#allocation7 + $0xd0] sm:$0xff]  ;;  %v211_v29 = vld [vmem:[#allocation7 + $0xe8] sm:$0xff] }
  0x4c   :  { %398 = vmatprep.subr.bf16.mxu0 %v397_v52  ;;  %422 = vmatprep.subr.bf16.mxu1 %v421_v61  ;;  %v435_v28 = vpack.c.bf16 %v208_v27, %v206_v26  ;;  %v213_v30 = vld [vmem:[#allocation7 + $0xf8] sm:$0xff]  ;;  %v210_v32 = vld [vmem:[#allocation7 + $0xe0] sm:$0xff]  ;;  %v212_v33 = vld [vmem:[#allocation7 + $0xf0] sm:$0xff] }
  0x4d   :  { %v437_v31 = vpack.c.bf16 %v213_v30, %v211_v29  ;;  %v439_v34 = vpack.c.bf16 %v212_v33, %v210_v32  ;;  %v337_v36 = vld [vmem:[%s652_s2] ss:$0 sm:$0xff]  ;;  %s560_s2 = smov [#allocation8]  }
  0x4e   :  { %v214_v44 = vld [vmem:[%s654_s4] sm:$0x3]  ;;  %s327_s9 = sshll.u32 %s560_s2, 4  ;;  %s328_s9 = int_to_ptr.vmem [resolvable:$true] %s327_s9 }
  0x4f   :  { %400 = vmatpush3.bf16.msra.mxu0 %v399_v59  ;;  %424 = vmatpush1.bf16.msra.mxu1 %v423_v6  ;;  %v219_v46 = vrot.slane %v214_v44, %v218_v43  ;;  %v223_v47 = vrot.slane %v214_v44, %v222_v45  ;;  %s524_s4 = scalar_lea.vmem %s328_s9, 64  ;;  %p529_p11 = scmp.lt.s32.totalorder %s328_s9, %s328_s9 }
  0x50   :  { %402 = vmatprep.subr.bf16.mxu0 %v401_v0  ;;  %426 = vmatprep.subr.bf16.mxu1 %v425_v9  ;;  %p525_p10 = scmp.ne.s32.totalorder %s328_s9, %s524_s4  ;;  %p530_p12 = scmp.lt.s32.totalorder %s524_s4, %s524_s4 }
  0x52   :  { %p531_p13 = por %p530_p12, %p529_p11 }
  0x53   :  { %404 = vmatpush3.bf16.msra.mxu0 %v403_v7  ;;  %428 = vmatpush1.bf16.msra.mxu1 %v427_v16 }
  0x54   :  { %406 = vmatprep.subr.bf16.mxu0 %v405_v12  ;;  %430 = vmatprep.subr.bf16.mxu1 %v429_v18  ;;  %p532_p0 = pnand %p531_p13, %p525_p10 }
  0x57   :  { %408 = vmatpush3.bf16.msra.mxu0 %v407_v17  ;;  %432 = vmatpush1.bf16.msra.mxu1 %v431_v21 }
  0x58   :  { %434 = vmatprep.subr.bf16.mxu1 %v433_v24 }
  0x5a   :  { %176 = vmatmul.mubr.f32.vlgmr.msra.gmra.mrb[0].mxu0 %v627_v25 }
  0x5b   :  { %436 = vmatpush1.bf16.msra.mxu1 %v435_v28 }
  0x5c   :  { %438 = vmatprep.subr.bf16.mxu1 %v437_v31 }
  0x5f   :  { %440 = vmatpush1.bf16.msra.mxu1 %v439_v34 }
 0x12d   :  { %v374_v25 = vpop.f32.mrb[0].mxu0 }
 0x12e   :  { %v375_v37 = vpop.f32.mrb[1].mxu0 }
 0x12f   :  { %v376_v38 = vadd.f32 %v375_v37, %v374_v25 }
 0x131   :  { %v178_v39 = vadd.f32 %v376_v38, %v337_v36 }
 0x133   :  { %v181_v40 = vmax.f32 %v178_v39, 0.0 }
 0x135   :  { %291 = vmatmul.mubr.f32.vlgmr.msra.gmra.mrb[0].mxu1 %v181_v40 }
 0x208   :  { %v292_v48 = vpop.f32.mrb[0].mxu1 }
 0x209   :  { %v293_v49 = vadd.f32 %v292_v48, %v219_v46  ;;  %v294_v50 = vpop.f32.mrb[1].mxu1 }
 0x20a   :  { %v295_v51 = vadd.f32 %v294_v50, %v223_v47 }
 0x20b   :  { %v339_v52 = vmul.f32 -1.442695, %v293_v49 }
 0x20c   :  { %v340_v53 = vmul.f32 -1.442695, %v295_v51 }
 0x20d   :  { %450 = vpow2.f32 %v339_v52 }
 0x20e   :  { %452 = vpow2.f32 %v340_v53 }
 0x217   :  { %v451_v54 = vpop.eup %450 }
 0x218   :  { %v453_v55 = vpop.eup %452  ;;  %v303_v56 = vadd.f32 1.0, %v451_v54 }
 0x219   :  { %v304_v57 = vadd.f32 1.0, %v453_v55 }
 0x21a   :  { %454 = vrcp.f32 %v303_v56 }
 0x21b   :  { %456 = vrcp.f32 %v304_v57 }
 0x224   :  { %v455_v58 = vpop.eup %454 }
 0x225   :  { %v457_v59 = vpop.eup %456 }
 0x226   :  { %v311_v60 = vcombine.low %v455_v58, %v457_v59 }
 0x228   :  { %341 = vst.sshfl [vmem:[#allocation8] sm:$0x33 pattern:$0x76325410] %v311_v60 }
 0x229   :  { %535 = shalt.err (!%p532_p0)
}
 0x22a   :  { %s536_s12 = scalar_lea.hbm %s655_s5, 64 }
 0x22b   :  { %p537_p1 = scmp.ne.s32.totalorder %s655_s5, %s536_s12  ;;  %p540_p2 = scmp.lt.u32.totalorder %s536_s12, %s655_s5 }
 0x22d   :  { %p542_p3 = pnand %p540_p2, %p537_p1 }
 0x22f   :  { %545 = shalt.err (!%p542_p3)
}
 0x230   :  { %330 = dma.vmem_to_hbm [thread:$0]  %s328_s9, 64, %s655_s5, [#allocation4]  }
 0x231   :  { %550 = dma.done.wait [#allocation4], 64  }
 0x232   :  { %551 = vsyncadd [#allocation4], 4294967232 }
 0x233   :  { %334 = vsyncpa [#allocation3], 1 }
 0x234   :  { %335 = vsyncpa [#allocation6], 1 }
 0x235   :  { %336 = vsyncpa [#allocation4], 1 }

</bundles_post_ra>
